<compile_context>
chip_gen: v6e
topology: v6e:2x2x1
jax: 0.10.0
libtpu: 0.0.40
codegen_flags: <defaults>
</compile_context>

<pallas_src>
import functools

import jax
import jax.numpy as jnp
from jax import lax
from jax.experimental import pallas as pl
from jax.experimental.pallas import tpu as pltpu


def _silu(v):
    return v * jax.nn.sigmoid(v)


# ----------------------------------------------------------------------------
# Fused EwaldBlock kernel: single grid step, all structures lane-batched.
# ----------------------------------------------------------------------------
def _ewald_block_kernel(seg_ref, blk_ref, x_ref, kall_ref, ht_ref, kf_ref,
                        pre_w1_ref, pre_w2_ref, w0_ref, res_w_ref,
                        out_ref, cs_sc,
                        *, num_hidden, emb, nk, mxu_dtype):
    f32 = jnp.float32
    lanes = kall_ref.shape[-1]                               # B*K

    # ---- pre_residual(h) in transposed [E, N] layout (native W @ X form) ---
    ht = ht_ref[...]                                         # [E, N] f32
    t = _silu(lax.dot_general(pre_w1_ref[...], ht.astype(mxu_dtype),
                              (((1,), (0,)), ((), ())),
                              preferred_element_type=f32))
    t = _silu(lax.dot_general(pre_w2_ref[...], t.astype(mxu_dtype),
                              (((1,), (0,)), ((), ())),
                              preferred_element_type=f32))
    hres_t = ht + t                                          # [E, N] f32

    # ---- k.x for all structures at once: 3 VPU broadcast FMAs --------------
    x = x_ref[...]                                           # [N, 3]
    kall = kall_ref[...]                                     # [3, B*K]
    dot_all = (x[:, 0:1] * kall[0:1, :]
               + x[:, 1:2] * kall[1:2, :]
               + x[:, 2:3] * kall[2:3, :])                   # [N, B*K] f32

    # Block mask: lane l belongs to structure blk[l]; atom n to seg[n].
    # Atoms with seg outside [0, B) are fully masked -> zero output rows.
    mask = seg_ref[...] == blk_ref[...]                      # [N,1]==[1,B*K]
    m_dot = jnp.where(mask, dot_all, 0.0)                    # f32 (dot output)

    # cos | sin into the two lane halves of the VMEM scratch (no concat)
    cs_sc[:, 0:lanes] = jnp.where(mask, jnp.cos(dot_all),
                                  0.0).astype(cs_sc.dtype)
    cs_sc[:, lanes:2 * lanes] = jnp.where(mask, jnp.sin(dot_all),
                                          0.0).astype(cs_sc.dtype)
    cs = cs_sc[...]                                          # [N, B*2K]

    # ---- structure factors, fused real|imag:  sf^T = hres^T @ cs -----------
    sf_t = lax.dot_general(hres_t.astype(mxu_dtype), cs,
                           (((1,), (0,)), ((), ())),
                           preferred_element_type=f32)       # [E, B*2K]
    filt_t = sf_t * kf_ref[...]                              # 0.01 folded in

    # ---- back-projection:  contrib = cs @ filt^T ----------------------------
    contrib = lax.dot_general(cs, filt_t.astype(mxu_dtype),
                              (((1,), (1,)), ((), ())),
                              preferred_element_type=f32)    # [N, E]

    # ---- output Dense + residual MLP (weights pre-transposed to [in, out]) -
    def dense(a, w):
        return lax.dot_general(a.astype(mxu_dtype), w,
                               (((1,), (0,)), ((), ())),
                               preferred_element_type=f32)

    hu = _silu(dense(contrib, w0_ref[...]))
    for i in range(num_hidden):                              # static unroll
        r = _silu(dense(hu, res_w_ref[2 * i]))
        r = _silu(dense(r, res_w_ref[2 * i + 1]))
        hu = hu + r                                          # residual in f32

    # ---- dot[n, j]: fold the masked k.x over the B lane blocks -------------
    d = m_dot[:, 0:nk]
    for b in range(1, lanes // nk):                          # static unroll
        d = d + m_dot[:, b * nk:(b + 1) * nk]

    # ---- single lane-dense slab writeback: [ h_update | dot ] --------------
    out_ref[:, 0:emb] = hu.astype(out_ref.dtype)
    out_ref[:, emb:emb + nk] = d.astype(out_ref.dtype)


# ----------------------------------------------------------------------------
# EwaldBlock forward wrapper (parameter plumbing in plain JAX, one pallas_call)
# ----------------------------------------------------------------------------
def ewald_block_forward(h, x, k, num_batch, batch_seg, params,
                        mxu_dtype=jnp.bfloat16):
    n, e = h.shape
    bsz, nk, _ = k.shape
    assert bsz == num_batch
    lanes = num_batch * nk                                   # B*K

    seg2d = batch_seg.reshape(n, 1).astype(jnp.int32)
    blk_row = (jnp.arange(lanes, dtype=jnp.int32) // nk).reshape(1, lanes)
    k_all = jnp.transpose(k, (2, 0, 1)).reshape(3, lanes)    # k_all[d, b*K+j]
    h_t = h.T                                                # [E, N]

    # kfilter^T tiled over B structures x (cos|sin); 0.01 prefactor folded in.
    kf_t = params["up_w"] @ params["down_w"]                 # [E, K]
    kf_full = 0.01 * jnp.tile(kf_t, (1, 2 * num_batch))      # [E, B*2K] f32

    num_hidden = len(params["ewald_res"])
    pre_w1 = params["pre_w1"].astype(mxu_dtype)              # [out, in] (LHS)
    pre_w2 = params["pre_w2"].astype(mxu_dtype)
    w0_t = params["ewald_w0"].T.astype(mxu_dtype)            # [in, out] (RHS)
    if num_hidden:
        res_w_t = jnp.stack([w.T for pair in params["ewald_res"] for w in pair]
                            ).astype(mxu_dtype)
    else:
        res_w_t = jnp.zeros((2, e, e), mxu_dtype)            # unused dummy

    kernel = functools.partial(_ewald_block_kernel, num_hidden=num_hidden,
                               emb=e, nk=nk, mxu_dtype=mxu_dtype)

    out = pl.pallas_call(
        kernel,
        out_shape=jax.ShapeDtypeStruct((n, e + nk), jnp.float32),
        grid_spec=pltpu.PrefetchScalarGridSpec(
            num_scalar_prefetch=0,
            grid=(1,),
            in_specs=[
                pl.BlockSpec((n, 1), lambda i: (0, 0)),            # seg
                pl.BlockSpec((1, lanes), lambda i: (0, 0)),        # lane->struct
                pl.BlockSpec((n, 3), lambda i: (0, 0)),            # x
                pl.BlockSpec((3, lanes), lambda i: (0, 0)),        # k_all
                pl.BlockSpec((e, n), lambda i: (0, 0)),            # h^T
                pl.BlockSpec((e, 2 * lanes), lambda i: (0, 0)),    # kfilter^T
                pl.BlockSpec((e, e), lambda i: (0, 0)),            # pre_w1
                pl.BlockSpec((e, e), lambda i: (0, 0)),            # pre_w2
                pl.BlockSpec((e, e), lambda i: (0, 0)),            # ewald_w0^T
                pl.BlockSpec(res_w_t.shape, lambda i: (0, 0, 0)),  # res ws^T
            ],
            out_specs=pl.BlockSpec((n, e + nk), lambda i: (0, 0)),
            scratch_shapes=[pltpu.VMEM((n, 2 * lanes), mxu_dtype)],  # cos|sin
        ),
        compiler_params=pltpu.CompilerParams(
            dimension_semantics=("arbitrary",),
            vmem_limit_bytes=32 * 1024 * 1024),
    )(seg2d, blk_row, x, k_all, h_t, kf_full, pre_w1, pre_w2, w0_t, res_w_t)

    h_update = out[:, :e]
    dot = out[:, e:]
    sinc_damping = 1.0  # use_pbc == True
    return h_update, dot, sinc_damping


# ----------------------------------------------------------------------------
# Deterministic parameter init (stand-in for he_orthogonal_init)
# ----------------------------------------------------------------------------
def init_linear(key, out_f, in_f):
    w = jax.random.normal(key, (out_f, in_f), jnp.float32)
    mean = jnp.mean(w, axis=1, keepdims=True)
    var = jnp.var(w, axis=1, ddof=1, keepdims=True)
    w = (w - mean) / jnp.sqrt(var + 1e-6)
    return w * (1.0 / in_f) ** 0.5


# ----------------------------------------------------------------------------
# Pure-JAX reference (mirrors the PyTorch forward) for correctness check
# ----------------------------------------------------------------------------
def ref_forward(h, x, k, num_batch, batch_seg, params):
    hres = h + _silu(_silu(h @ params["pre_w1"].T) @ params["pre_w2"].T)
    kb = k[batch_seg]                                          # [N, K, 3]
    dot = jnp.sum(kb * x[:, None, :], axis=-1)                 # [N, K]
    kfilter = (params["up_w"] @ params["down_w"]).T            # [K, E]
    cosd, sind = jnp.cos(dot), jnp.sin(dot)
    n, e = hres.shape
    kk = dot.shape[-1]
    sf_real = jnp.zeros((num_batch, kk, e), jnp.float32).at[batch_seg].add(
        hres[:, None, :] * cosd[:, :, None])
    sf_imag = jnp.zeros((num_batch, kk, e), jnp.float32).at[batch_seg].add(
        hres[:, None, :] * sind[:, :, None])
    h_update = 0.01 * jnp.sum(
        sf_real[batch_seg] * kfilter[None] * cosd[:, :, None]
        + sf_imag[batch_seg] * kfilter[None] * sind[:, :, None], axis=1)
    h_update = _silu(h_update @ params["ewald_w0"].T)
    for wa, wb in params["ewald_res"]:
        h_update = h_update + _silu(_silu(h_update @ wa.T) @ wb.T)
    return h_update, dot


# ----------------------------------------------------------------------------
if __name__ == "__main__":
    N, E, D, K, B, NUM_HIDDEN = 16, 32, 16, 8, 2, 2

    key = jax.random.PRNGKey(0)
    keys = jax.random.split(key, 16)

    h = jax.random.normal(keys[0], (N, E), jnp.float32)
    x = jax.random.normal(keys[1], (N, 3), jnp.float32)
    k = jax.random.normal(keys[2], (B, K, 3), jnp.float32)
    batch_seg = jnp.concatenate(
        [jnp.zeros(9, jnp.int32), jnp.ones(N - 9, jnp.int32)])

    params = {
        "pre_w1": init_linear(keys[3], E, E),
        "pre_w2": init_linear(keys[4], E, E),
        "down_w": init_linear(keys[5], D, K),   # shared_downprojection: K -> D
        "up_w": init_linear(keys[6], E, D),     # up: D -> E
        "ewald_w0": init_linear(keys[7], E, E),
        "ewald_res": [
            (init_linear(keys[8 + 2 * i], E, E),
             init_linear(keys[9 + 2 * i], E, E))
            for i in range(NUM_HIDDEN)
        ],
    }

    # f32-operand path (tight semantics check) and bf16-operand path (perf).
    h_f32, dot_f32, _ = ewald_block_forward(
        h, x, k, B, batch_seg, params, mxu_dtype=jnp.float32)
    h_bf16, dot_bf16, _ = ewald_block_forward(
        h, x, k, B, batch_seg, params, mxu_dtype=jnp.bfloat16)
    jax.block_until_ready((h_f32, dot_f32, h_bf16, dot_bf16))

    h_ref, dot_ref = ref_forward(h, x, k, B, batch_seg, params)

    # dot is computed on the VPU in f32 on both paths -> stays tight.
    assert jnp.allclose(dot_f32, dot_ref, rtol=1e-3, atol=1e-3), "dot mismatch"
    assert jnp.allclose(dot_bf16, dot_ref, rtol=1e-3, atol=1e-3), "bf16 dot mismatch"
    # f32-operand path.
    assert jnp.allclose(h_f32, h_ref, rtol=2e-3, atol=2e-3), "h_update mismatch"
    # bf16-operand / f32-accumulate path: loose relative check.
    scale = float(jnp.max(jnp.abs(h_ref))) + 1e-6
    err = float(jnp.max(jnp.abs(h_bf16 - h_ref)))
    assert err <= 0.08 * scale + 2e-3, f"bf16 h_update error too large: {err}"

    print("KERNEL_OK")
</pallas_src>

<mosaic_0001>
module attributes {stable_mosaic.version = 11 : i64} {
  func.func @_ewald_block_kernel(%arg0: i32, %arg1: memref<16x1xi32, #tpu.memory_space<vmem>>, %arg2: memref<1x16xi32, #tpu.memory_space<vmem>>, %arg3: memref<16x3xf32, #tpu.memory_space<vmem>>, %arg4: memref<3x16xf32, #tpu.memory_space<vmem>>, %arg5: memref<32x16xf32, #tpu.memory_space<vmem>>, %arg6: memref<32x32xf32, #tpu.memory_space<vmem>>, %arg7: memref<32x32xf32, #tpu.memory_space<vmem>>, %arg8: memref<32x32xf32, #tpu.memory_space<vmem>>, %arg9: memref<32x32xf32, #tpu.memory_space<vmem>>, %arg10: memref<4x32x32xf32, #tpu.memory_space<vmem>>, %arg11: memref<16x40xf32, #tpu.memory_space<vmem>>, %arg12: memref<16x32xf32, #tpu.memory_space<vmem>>) attributes {dimension_semantics = [#tpu.dimension_semantics<arbitrary>], iteration_bounds = array<i64: 1>, scalar_prefetch = 0 : i64, scratch_operands = 1 : i64, tpu.core_type = #tpu.core_type<tc>, window_params = [{pipeline_mode = #tpu.pipeline_mode<synchronous>, transform_indices = @transform_0, window_bounds = array<i64: 16, 1>}, {pipeline_mode = #tpu.pipeline_mode<synchronous>, transform_indices = @transform_1, window_bounds = array<i64: 1, 16>}, {pipeline_mode = #tpu.pipeline_mode<synchronous>, transform_indices = @transform_2, window_bounds = array<i64: 16, 3>}, {pipeline_mode = #tpu.pipeline_mode<synchronous>, transform_indices = @transform_3, window_bounds = array<i64: 3, 16>}, {pipeline_mode = #tpu.pipeline_mode<synchronous>, transform_indices = @transform_4, window_bounds = array<i64: 32, 16>}, {pipeline_mode = #tpu.pipeline_mode<synchronous>, transform_indices = @transform_5, window_bounds = array<i64: 32, 32>}, {pipeline_mode = #tpu.pipeline_mode<synchronous>, transform_indices = @transform_6, window_bounds = array<i64: 32, 32>}, {pipeline_mode = #tpu.pipeline_mode<synchronous>, transform_indices = @transform_7, window_bounds = array<i64: 32, 32>}, {pipeline_mode = #tpu.pipeline_mode<synchronous>, transform_indices = @transform_8, window_bounds = array<i64: 32, 32>}, {pipeline_mode = #tpu.pipeline_mode<synchronous>, transform_indices = @transform_9, window_bounds = array<i64: 4, 32, 32>}, {pipeline_mode = #tpu.pipeline_mode<synchronous>, transform_indices = @transform_10, window_bounds = array<i64: 16, 40>}]} {
    %c0 = arith.constant 0 : index
    %c0_0 = arith.constant 0 : index
    %0 = vector.load %arg5[%c0, %c0_0] : memref<32x16xf32, #tpu.memory_space<vmem>>, vector<32x16xf32>
    %c0_1 = arith.constant 0 : index
    %c0_2 = arith.constant 0 : index
    %1 = vector.load %arg7[%c0_1, %c0_2] : memref<32x32xf32, #tpu.memory_space<vmem>>, vector<32x32xf32>
    %cst = arith.constant dense<0.000000e+00> : vector<32x16xf32>
    %2 = tpu.matmul %1, %0, %cst {dimension_numbers = #tpu.dot_dimension_numbers<[1], [0], [0], [1], [0, 0, 1, 1], [], []>} : vector<32x32xf32>, vector<32x16xf32>, vector<32x16xf32> -> vector<32x16xf32>
    %3 = arith.negf %2 : vector<32x16xf32>
    %4 = math.exp %3 : vector<32x16xf32>
    %cst_3 = arith.constant 1.000000e+00 : f32
    %5 = vector.broadcast %cst_3 : f32 to vector<32x16xf32>
    %6 = arith.addf %5, %4 : vector<32x16xf32>
    %7 = arith.divf %5, %6 : vector<32x16xf32>
    %8 = arith.mulf %2, %7 : vector<32x16xf32>
    %c0_4 = arith.constant 0 : index
    %c0_5 = arith.constant 0 : index
    %9 = vector.load %arg8[%c0_4, %c0_5] : memref<32x32xf32, #tpu.memory_space<vmem>>, vector<32x32xf32>
    %cst_6 = arith.constant dense<0.000000e+00> : vector<32x16xf32>
    %10 = tpu.matmul %9, %8, %cst_6 {dimension_numbers = #tpu.dot_dimension_numbers<[1], [0], [0], [1], [0, 0, 1, 1], [], []>} : vector<32x32xf32>, vector<32x16xf32>, vector<32x16xf32> -> vector<32x16xf32>
    %11 = arith.negf %10 : vector<32x16xf32>
    %12 = math.exp %11 : vector<32x16xf32>
    %cst_7 = arith.constant 1.000000e+00 : f32
    %13 = vector.broadcast %cst_7 : f32 to vector<32x16xf32>
    %14 = arith.addf %13, %12 : vector<32x16xf32>
    %15 = arith.divf %13, %14 : vector<32x16xf32>
    %16 = arith.mulf %10, %15 : vector<32x16xf32>
    %17 = arith.addf %0, %16 : vector<32x16xf32>
    %c0_8 = arith.constant 0 : index
    %c0_9 = arith.constant 0 : index
    %18 = vector.load %arg3[%c0_8, %c0_9] : memref<16x3xf32, #tpu.memory_space<vmem>>, vector<16x3xf32>
    %c0_10 = arith.constant 0 : index
    %c0_11 = arith.constant 0 : index
    %19 = vector.load %arg4[%c0_10, %c0_11] : memref<3x16xf32, #tpu.memory_space<vmem>>, vector<3x16xf32>
    %20 = vector.extract_strided_slice %18 {offsets = [0, 0], sizes = [16, 1], strides = [1, 1]} : vector<16x3xf32> to vector<16x1xf32>
    %21 = vector.extract_strided_slice %19 {offsets = [0, 0], sizes = [1, 16], strides = [1, 1]} : vector<3x16xf32> to vector<1x16xf32>
    %22 = vector.broadcast %20 : vector<16x1xf32> to vector<16x16xf32>
    %23 = vector.broadcast %21 : vector<1x16xf32> to vector<16x16xf32>
    %24 = arith.mulf %22, %23 : vector<16x16xf32>
    %25 = vector.extract_strided_slice %18 {offsets = [0, 1], sizes = [16, 1], strides = [1, 1]} : vector<16x3xf32> to vector<16x1xf32>
    %26 = vector.extract_strided_slice %19 {offsets = [1, 0], sizes = [1, 16], strides = [1, 1]} : vector<3x16xf32> to vector<1x16xf32>
    %27 = vector.broadcast %25 : vector<16x1xf32> to vector<16x16xf32>
    %28 = vector.broadcast %26 : vector<1x16xf32> to vector<16x16xf32>
    %29 = arith.mulf %27, %28 : vector<16x16xf32>
    %30 = arith.addf %24, %29 : vector<16x16xf32>
    %31 = vector.extract_strided_slice %18 {offsets = [0, 2], sizes = [16, 1], strides = [1, 1]} : vector<16x3xf32> to vector<16x1xf32>
    %32 = vector.extract_strided_slice %19 {offsets = [2, 0], sizes = [1, 16], strides = [1, 1]} : vector<3x16xf32> to vector<1x16xf32>
    %33 = vector.broadcast %31 : vector<16x1xf32> to vector<16x16xf32>
    %34 = vector.broadcast %32 : vector<1x16xf32> to vector<16x16xf32>
    %35 = arith.mulf %33, %34 : vector<16x16xf32>
    %36 = arith.addf %30, %35 : vector<16x16xf32>
    %c0_12 = arith.constant 0 : index
    %c0_13 = arith.constant 0 : index
    %37 = vector.load %arg1[%c0_12, %c0_13] : memref<16x1xi32, #tpu.memory_space<vmem>>, vector<16x1xi32>
    %c0_14 = arith.constant 0 : index
    %c0_15 = arith.constant 0 : index
    %38 = vector.load %arg2[%c0_14, %c0_15] : memref<1x16xi32, #tpu.memory_space<vmem>>, vector<1x16xi32>
    %39 = vector.broadcast %37 : vector<16x1xi32> to vector<16x16xi32>
    %40 = vector.broadcast %38 : vector<1x16xi32> to vector<16x16xi32>
    %41 = arith.cmpi eq, %39, %40 : vector<16x16xi32>
    %cst_16 = arith.constant 0.000000e+00 : f32
    %42 = vector.broadcast %cst_16 : f32 to vector<16x16xf32>
    %43 = arith.select %41, %36, %42 : vector<16x16xi1>, vector<16x16xf32>
    %44 = math.cos %36 : vector<16x16xf32>
    %cst_17 = arith.constant 0.000000e+00 : f32
    %45 = vector.broadcast %cst_17 : f32 to vector<16x16xf32>
    %46 = arith.select %41, %44, %45 : vector<16x16xi1>, vector<16x16xf32>
    %c0_18 = arith.constant 0 : index
    %c0_19 = arith.constant 0 : index
    %47 = vector.load %arg12[%c0_18, %c0_19] : memref<16x32xf32, #tpu.memory_space<vmem>>, vector<16x16xf32>
    tpu.vector_store %arg12[%c0_18, %c0_19], %46 {strides = array<i32>} : memref<16x32xf32, #tpu.memory_space<vmem>>, vector<16x16xf32>,
    %48 = math.sin %36 : vector<16x16xf32>
    %cst_20 = arith.constant 0.000000e+00 : f32
    %49 = vector.broadcast %cst_20 : f32 to vector<16x16xf32>
    %50 = arith.select %41, %48, %49 : vector<16x16xi1>, vector<16x16xf32>
    %c0_21 = arith.constant 0 : index
    %c16 = arith.constant 16 : index
    %51 = vector.load %arg12[%c0_21, %c16] : memref<16x32xf32, #tpu.memory_space<vmem>>, vector<16x16xf32>
    tpu.vector_store %arg12[%c0_21, %c16], %50 {strides = array<i32>} : memref<16x32xf32, #tpu.memory_space<vmem>>, vector<16x16xf32>,
    %c0_22 = arith.constant 0 : index
    %c0_23 = arith.constant 0 : index
    %52 = vector.load %arg12[%c0_22, %c0_23] : memref<16x32xf32, #tpu.memory_space<vmem>>, vector<16x32xf32>
    %cst_24 = arith.constant dense<0.000000e+00> : vector<32x32xf32>
    %53 = tpu.matmul %17, %52, %cst_24 {dimension_numbers = #tpu.dot_dimension_numbers<[1], [0], [0], [1], [0, 0, 1, 1], [], []>} : vector<32x16xf32>, vector<16x32xf32>, vector<32x32xf32> -> vector<32x32xf32>
    %c0_25 = arith.constant 0 : index
    %c0_26 = arith.constant 0 : index
    %54 = vector.load %arg6[%c0_25, %c0_26] : memref<32x32xf32, #tpu.memory_space<vmem>>, vector<32x32xf32>
    %55 = arith.mulf %53, %54 : vector<32x32xf32>
    %cst_27 = arith.constant dense<0.000000e+00> : vector<16x32xf32>
    %56 = tpu.matmul %52, %55, %cst_27 {dimension_numbers = #tpu.dot_dimension_numbers<[1], [1], [0], [0], [0, 0, 1, 0], [], []>} : vector<16x32xf32>, vector<32x32xf32>, vector<16x32xf32> -> vector<16x32xf32>
    %c0_28 = arith.constant 0 : index
    %c0_29 = arith.constant 0 : index
    %57 = vector.load %arg9[%c0_28, %c0_29] : memref<32x32xf32, #tpu.memory_space<vmem>>, vector<32x32xf32>
    %cst_30 = arith.constant dense<0.000000e+00> : vector<16x32xf32>
    %58 = tpu.matmul %56, %57, %cst_30 {dimension_numbers = #tpu.dot_dimension_numbers<[1], [0], [0], [1], [0, 0, 1, 1], [], []>} : vector<16x32xf32>, vector<32x32xf32>, vector<16x32xf32> -> vector<16x32xf32>
    %59 = arith.negf %58 : vector<16x32xf32>
    %60 = math.exp %59 : vector<16x32xf32>
    %cst_31 = arith.constant 1.000000e+00 : f32
    %61 = vector.broadcast %cst_31 : f32 to vector<16x32xf32>
    %62 = arith.addf %61, %60 : vector<16x32xf32>
    %63 = arith.divf %61, %62 : vector<16x32xf32>
    %64 = arith.mulf %58, %63 : vector<16x32xf32>
    %c0_32 = arith.constant 0 : index
    %c0_33 = arith.constant 0 : index
    %c0_34 = arith.constant 0 : index
    %65 = vector.load %arg10[%c0_32, %c0_33, %c0_34] : memref<4x32x32xf32, #tpu.memory_space<vmem>>, vector<1x32x32xf32>
    %66 = vector.shape_cast %65 : vector<1x32x32xf32> to vector<32x32xf32>
    %cst_35 = arith.constant dense<0.000000e+00> : vector<16x32xf32>
    %67 = tpu.matmul %64, %66, %cst_35 {dimension_numbers = #tpu.dot_dimension_numbers<[1], [0], [0], [1], [0, 0, 1, 1], [], []>} : vector<16x32xf32>, vector<32x32xf32>, vector<16x32xf32> -> vector<16x32xf32>
    %68 = arith.negf %67 : vector<16x32xf32>
    %69 = math.exp %68 : vector<16x32xf32>
    %cst_36 = arith.constant 1.000000e+00 : f32
    %70 = vector.broadcast %cst_36 : f32 to vector<16x32xf32>
    %71 = arith.addf %70, %69 : vector<16x32xf32>
    %72 = arith.divf %70, %71 : vector<16x32xf32>
    %73 = arith.mulf %67, %72 : vector<16x32xf32>
    %c1 = arith.constant 1 : index
    %c0_37 = arith.constant 0 : index
    %c0_38 = arith.constant 0 : index
    %74 = vector.load %arg10[%c1, %c0_37, %c0_38] : memref<4x32x32xf32, #tpu.memory_space<vmem>>, vector<1x32x32xf32>
    %75 = vector.shape_cast %74 : vector<1x32x32xf32> to vector<32x32xf32>
    %cst_39 = arith.constant dense<0.000000e+00> : vector<16x32xf32>
    %76 = tpu.matmul %73, %75, %cst_39 {dimension_numbers = #tpu.dot_dimension_numbers<[1], [0], [0], [1], [0, 0, 1, 1], [], []>} : vector<16x32xf32>, vector<32x32xf32>, vector<16x32xf32> -> vector<16x32xf32>
    %77 = arith.negf %76 : vector<16x32xf32>
    %78 = math.exp %77 : vector<16x32xf32>
    %cst_40 = arith.constant 1.000000e+00 : f32
    %79 = vector.broadcast %cst_40 : f32 to vector<16x32xf32>
    %80 = arith.addf %79, %78 : vector<16x32xf32>
    %81 = arith.divf %79, %80 : vector<16x32xf32>
    %82 = arith.mulf %76, %81 : vector<16x32xf32>
    %83 = arith.addf %64, %82 : vector<16x32xf32>
    %c2 = arith.constant 2 : index
    %c0_41 = arith.constant 0 : index
    %c0_42 = arith.constant 0 : index
    %84 = vector.load %arg10[%c2, %c0_41, %c0_42] : memref<4x32x32xf32, #tpu.memory_space<vmem>>, vector<1x32x32xf32>
    %85 = vector.shape_cast %84 : vector<1x32x32xf32> to vector<32x32xf32>
    %cst_43 = arith.constant dense<0.000000e+00> : vector<16x32xf32>
    %86 = tpu.matmul %83, %85, %cst_43 {dimension_numbers = #tpu.dot_dimension_numbers<[1], [0], [0], [1], [0, 0, 1, 1], [], []>} : vector<16x32xf32>, vector<32x32xf32>, vector<16x32xf32> -> vector<16x32xf32>
    %87 = arith.negf %86 : vector<16x32xf32>
    %88 = math.exp %87 : vector<16x32xf32>
    %cst_44 = arith.constant 1.000000e+00 : f32
    %89 = vector.broadcast %cst_44 : f32 to vector<16x32xf32>
    %90 = arith.addf %89, %88 : vector<16x32xf32>
    %91 = arith.divf %89, %90 : vector<16x32xf32>
    %92 = arith.mulf %86, %91 : vector<16x32xf32>
    %c3 = arith.constant 3 : index
    %c0_45 = arith.constant 0 : index
    %c0_46 = arith.constant 0 : index
    %93 = vector.load %arg10[%c3, %c0_45, %c0_46] : memref<4x32x32xf32, #tpu.memory_space<vmem>>, vector<1x32x32xf32>
    %94 = vector.shape_cast %93 : vector<1x32x32xf32> to vector<32x32xf32>
    %cst_47 = arith.constant dense<0.000000e+00> : vector<16x32xf32>
    %95 = tpu.matmul %92, %94, %cst_47 {dimension_numbers = #tpu.dot_dimension_numbers<[1], [0], [0], [1], [0, 0, 1, 1], [], []>} : vector<16x32xf32>, vector<32x32xf32>, vector<16x32xf32> -> vector<16x32xf32>
    %96 = arith.negf %95 : vector<16x32xf32>
    %97 = math.exp %96 : vector<16x32xf32>
    %cst_48 = arith.constant 1.000000e+00 : f32
    %98 = vector.broadcast %cst_48 : f32 to vector<16x32xf32>
    %99 = arith.addf %98, %97 : vector<16x32xf32>
    %100 = arith.divf %98, %99 : vector<16x32xf32>
    %101 = arith.mulf %95, %100 : vector<16x32xf32>
    %102 = arith.addf %83, %101 : vector<16x32xf32>
    %103 = vector.extract_strided_slice %43 {offsets = [0, 0], sizes = [16, 8], strides = [1, 1]} : vector<16x16xf32> to vector<16x8xf32>
    %104 = vector.extract_strided_slice %43 {offsets = [0, 8], sizes = [16, 8], strides = [1, 1]} : vector<16x16xf32> to vector<16x8xf32>
    %105 = arith.addf %103, %104 : vector<16x8xf32>
    %c0_49 = arith.constant 0 : index
    %c0_50 = arith.constant 0 : index
    %106 = vector.load %arg11[%c0_49, %c0_50] : memref<16x40xf32, #tpu.memory_space<vmem>>, vector<16x32xf32>
    tpu.vector_store %arg11[%c0_49, %c0_50], %102 {strides = array<i32>} : memref<16x40xf32, #tpu.memory_space<vmem>>, vector<16x32xf32>,
    %c0_51 = arith.constant 0 : index
    %c32 = arith.constant 32 : index
    %107 = vector.load %arg11[%c0_51, %c32] : memref<16x40xf32, #tpu.memory_space<vmem>>, vector<16x8xf32>
    tpu.vector_store %arg11[%c0_51, %c32], %105 {strides = array<i32>} : memref<16x40xf32, #tpu.memory_space<vmem>>, vector<16x8xf32>,
    return
  }
  func.func @transform_0(%arg0: i32) -> (i32, i32) {
    %c0_i32 = arith.constant 0 : i32
    %c0_i32_0 = arith.constant 0 : i32
    %c0_i32_1 = arith.constant 0 : i32
    return %c0_i32, %c0_i32_0 : i32, i32
  }
  func.func @transform_1(%arg0: i32) -> (i32, i32) {
    %c0_i32 = arith.constant 0 : i32
    %c0_i32_0 = arith.constant 0 : i32
    %c0_i32_1 = arith.constant 0 : i32
    return %c0_i32, %c0_i32_0 : i32, i32
  }
  func.func @transform_2(%arg0: i32) -> (i32, i32) {
    %c0_i32 = arith.constant 0 : i32
    %c0_i32_0 = arith.constant 0 : i32
    %c0_i32_1 = arith.constant 0 : i32
    return %c0_i32, %c0_i32_0 : i32, i32
  }
  func.func @transform_3(%arg0: i32) -> (i32, i32) {
    %c0_i32 = arith.constant 0 : i32
    %c0_i32_0 = arith.constant 0 : i32
    %c0_i32_1 = arith.constant 0 : i32
    return %c0_i32, %c0_i32_0 : i32, i32
  }
  func.func @transform_4(%arg0: i32) -> (i32, i32) {
    %c0_i32 = arith.constant 0 : i32
    %c0_i32_0 = arith.constant 0 : i32
    %c0_i32_1 = arith.constant 0 : i32
    return %c0_i32, %c0_i32_0 : i32, i32
  }
  func.func @transform_5(%arg0: i32) -> (i32, i32) {
    %c0_i32 = arith.constant 0 : i32
    %c0_i32_0 = arith.constant 0 : i32
    %c0_i32_1 = arith.constant 0 : i32
    return %c0_i32, %c0_i32_0 : i32, i32
  }
  func.func @transform_6(%arg0: i32) -> (i32, i32) {
    %c0_i32 = arith.constant 0 : i32
    %c0_i32_0 = arith.constant 0 : i32
    %c0_i32_1 = arith.constant 0 : i32
    return %c0_i32, %c0_i32_0 : i32, i32
  }
  func.func @transform_7(%arg0: i32) -> (i32, i32) {
    %c0_i32 = arith.constant 0 : i32
    %c0_i32_0 = arith.constant 0 : i32
    %c0_i32_1 = arith.constant 0 : i32
    return %c0_i32, %c0_i32_0 : i32, i32
  }
  func.func @transform_8(%arg0: i32) -> (i32, i32) {
    %c0_i32 = arith.constant 0 : i32
    %c0_i32_0 = arith.constant 0 : i32
    %c0_i32_1 = arith.constant 0 : i32
    return %c0_i32, %c0_i32_0 : i32, i32
  }
  func.func @transform_9(%arg0: i32) -> (i32, i32, i32) {
    %c0_i32 = arith.constant 0 : i32
    %c0_i32_0 = arith.constant 0 : i32
    %c0_i32_1 = arith.constant 0 : i32
    %c0_i32_2 = arith.constant 0 : i32
    return %c0_i32, %c0_i32_0, %c0_i32_1 : i32, i32, i32
  }
  func.func @transform_10(%arg0: i32) -> (i32, i32) {
    %c0_i32 = arith.constant 0 : i32
    %c0_i32_0 = arith.constant 0 : i32
    %c0_i32_1 = arith.constant 0 : i32
    return %c0_i32, %c0_i32_0 : i32, i32
  }
}

</mosaic_0001>

<bundles_post_ra>
// kernel: tpu_custom_call.1
= control target key start
LH: loop header
LB: loop body
LE: loop exit
PB: predicated region body
PF: predicated region fallthrough
CT: control target
= control target key end

     0   :  { %15 = vsyncpa [#allocation4], 0  ;;  %s2368_s0 = inlined_call_operand.vmem [shape: s32[16,1], index: 0, kind: input, shape index: {}]   ;;  %s2369_s1 = inlined_call_operand.vmem [shape: s32[1,16], index: 1, kind: input, shape index: {}]   ;;  %s2370_s2 = inlined_call_operand.vmem [shape: f32[16,3], index: 2, kind: input, shape index: {}]   ;;  %s2371_s3 = inlined_call_operand.hbm [shape: f32[3,16], index: 3, kind: input, shape index: {}]   ;;  %s2372_s4 = inlined_call_operand.vmem [shape: f32[32,16], index: 4, kind: input, shape index: {}]   ;;  %s2373_s5 = inlined_call_operand.vmem [shape: f32[32,32], index: 5, kind: input, shape index: {}]   ;;  %s2374_s6 = inlined_call_operand.vmem [shape: f32[32,32], index: 6, kind: input, shape index: {}]   ;;  %s2375_s7 = inlined_call_operand.vmem [shape: f32[32,32], index: 7, kind: input, shape index: {}]   ;;  %s2376_s8 = inlined_call_operand.hbm [shape: f32[32,32], index: 8, kind: input, shape index: {}]   ;;  %s2377_s9 = inlined_call_operand.hbm [shape: f32[4,32,32], index: 9, kind: input, shape index: {}]   ;;  %s2378_s10 = inlined_call_operand.hbm [shape: f32[16,40], index: 10, kind: output, shape index: {}]  }
   0x1   :  { %16 = vsyncpa [#allocation7], 0 }
   0x2   :  { %17 = vsyncpa [#allocation5], 0  ;;  %s2010_s13 = smov [#allocation6]  }
   0x3   :  { %s47_s14 = sshll.u32 %s2010_s13, 4  ;;  %s48_s14 = int_to_ptr.vmem [resolvable:$true] %s47_s14 }
   0x4   :  { %s1932_s15 = scalar_lea.vmem %s48_s14, 512  ;;  %p1937_p1 = scmp.lt.s32.totalorder %s48_s14, %s48_s14 }
   0x5   :  { %p1933_p0 = scmp.ne.s32.totalorder %s48_s14, %s1932_s15  ;;  %p1938_p2 = scmp.lt.s32.totalorder %s1932_s15, %s1932_s15 }
   0x7   :  { %p1939_p3 = por %p1938_p2, %p1937_p1 }
   0x9   :  { %p1940_p4 = pnand %p1939_p3, %p1933_p0 }
   0xb   :  { %1943 = shalt.err (!%p1940_p4)
}
   0xc   :  { %s2011_s16 = smov 128   ;;  %s2012_s17 = smov 8  }
   0xd   :  { %53 = dma.hbm_to_vmem [thread:$0]  %s2376_s8, 512, %s48_s14, [#allocation7], %s2011_s16, %s2011_s16, %s2012_s17  }
   0xe   :  { %s2013_s20 = smov [#allocation3]   ;;  %s2014_s22 = smov [#allocation8]  }
   0xf   :  { %s30_s21 = sshll.u32 %s2013_s20, 4  ;;  %s59_s23 = sshll.u32 %s2014_s22, 4  ;;  %s31_s21 = int_to_ptr.vmem [resolvable:$true] %s30_s21  ;;  %s60_s23 = int_to_ptr.vmem [resolvable:$true] %s59_s23 }
  0x10   :  { %s1952_s24 = scalar_lea.vmem %s31_s21, 64  ;;  %p1957_p6 = scmp.lt.s32.totalorder %s31_s21, %s31_s21 }
  0x11   :  { %p1953_p5 = scmp.ne.s32.totalorder %s31_s21, %s1952_s24  ;;  %p1958_p7 = scmp.lt.s32.totalorder %s1952_s24, %s1952_s24 }
  0x13   :  { %p1959_p8 = por %p1958_p7, %p1957_p6 }
  0x15   :  { %p1960_p9 = pnand %p1959_p8, %p1953_p5 }
  0x17   :  { %1963 = shalt.err (!%p1960_p9)
}
  0x18   :  { %33 = dma.hbm_to_vmem [thread:$0]  %s2371_s3, 64, %s31_s21, [#allocation4]  }
  0x19   :  { %s1972_s27 = scalar_lea.vmem %s60_s23, 2048  ;;  %p1977_p11 = scmp.lt.s32.totalorder %s60_s23, %s60_s23 }
  0x1a   :  { %p1973_p10 = scmp.ne.s32.totalorder %s60_s23, %s1972_s27  ;;  %p1978_p12 = scmp.lt.s32.totalorder %s1972_s27, %s1972_s27 }
  0x1c   :  { %p1979_p13 = por %p1978_p12, %p1977_p11 }
  0x1e   :  { %p1980_p0 = pnand %p1979_p13, %p1973_p10 }
  0x20   :  { %1983 = shalt.err (!%p1980_p0)
}
  0x21   :  { %65 = dma.hbm_to_vmem [thread:$0]  %s2377_s9, 2048, %s60_s23, [#allocation7], %s2011_s16, %s2011_s16, %s2012_s17  }
  0x22   :  { %2004 = dma.done.wait [#allocation4], 64  }
  0x23   :  { %2005 = vsyncadd [#allocation4], 4294967232 }
  0x24   :  { %2006 = dma.done.wait [#allocation7], 2560  }
  0x25   :  { %2007 = vsyncadd [#allocation7], 4294964736  ;;  %v2015_v0 = vmov 0   ;;  %v343_v1 = vld [vmem:[%s2370_s2 + $0x8] sm:$0xff]  ;;  %v342_v2 = vld [vmem:[%s2370_s2] sm:$0xff]  ;;  %vm83_vm0 = vcmask 261120   ;;  %v355_v15 = vlaneseq }
  0x26   :  { %1838 = vset.pattern.permute.xlu1 %v2015_v0  ;;  %1836 = vset.pattern.permute.xlu0 %v2015_v0  ;;  %v2107_v3 = vld [vmem:[%s2372_s4 + $0x18] sm:$0xff]  ;;  %v2112_v4 = vld [vmem:[%s2372_s4 + $0x10] sm:$0xff]  ;;  %v79_v5 = vld [vmem:[%s2374_s6] sm:$0xff]  ;;  %v2016_v7 = vmov 1   ;;  %v2017_v11 = vmov 2   ;;  %s2025_s11 = smov 120  }
  0x27   :  { %352 = vperm.xlu0 %1836, %v343_v1   ;;  %347 = vperm.xlu1 %1838, %v342_v2   ;;  %v2122_v6 = vld [vmem:[%s2372_s4 + $0x8] sm:$0xff]  ;;  %v2131_v8 = vld [vmem:[%s2372_s4] sm:$0xff]  ;;  %v81_v10 = vld [vmem:[%s2374_s6 + $0x10] sm:$0xff]  ;;  %v356_v16 = vshrl.u32 %v355_v15, 7  ;;  %v2018_v63 = vmov 683565275  }
  0x28   :  { %1706 = vmatprep.subr.mxu0 %v2107_v3  ;;  %1714 = vmatprep.mubr.msk.f32.mxu0 %vm83_vm0, %v79_v5  ;;  %v80_v9 = vld [vmem:[%s2374_s6 + $0x8] sm:$0xff]  ;;  %v82_v12 = vld [vmem:[%s2374_s6 + $0x18] sm:$0xff]  ;;  %v393_v14 = vld [vmem:[%s2368_s0] sm:$0xff]  ;;  %s2026_s2 = smov 32  }
  0x29   :  { %1707 = vmatpush3.msra.mxu0 %v2107_v3  ;;  %v394_v13 = vld [vmem:[%s2368_s0 + $0x8] sm:$0xff]  ;;  %v209_v17 = vld [vmem:[%s2375_s7] sm:$0xff]  ;;  %v357_v18 = vsub.s32 0, %v356_v16  ;;  %v344_v19 = vld [vmem:[#allocation3] sm:$0x7]  ;;  %v371_v20 = vsub.s32 1, %v356_v16 }
  0x2a   :  { %1708 = vmatprep.subr.mxu0 %v2112_v4  ;;  %1728 = vmatprep.mubr.msk.f32.mxu1 %vm83_vm0, %v209_v17  ;;  %v387_v25 = vsub.s32 2, %v356_v16 }
  0x2b   :  { %1709 = vmatpush3.msra.mxu0 %v2112_v4  ;;  %1837 = vset.pattern.permute.xlu0 %v2016_v7  ;;  %v358_v23 = vrot.slane %v344_v19, %v357_v18  ;;  %v372_v24 = vrot.slane %v344_v19, %v371_v20 }
  0x2c   :  { %1839 = vset.pattern.permute.xlu1 %v2016_v7  ;;  %1710 = vmatprep.subr.mxu0 %v2122_v6  ;;  %v388_v32 = vrot.slane %v344_v19, %v387_v25 }
  0x2d   :  { %366 = vperm.xlu0 %1837, %v343_v1   ;;  %362 = vperm.xlu1 %1839, %v342_v2  }
  0x2e   :  { %1711 = vmatpush3.msra.mxu0 %v2122_v6 }
  0x2f   :  { %1712 = vmatprep.subr.mxu0 %v2131_v8 }
  0x30   :  { %1713 = vmatpush3.msra.mxu0 %v2131_v8 }
  0x31   :  { %1715 = vmatmul.mubr.msk.f32.vlgmr.msra.gmra.mxu0 %vm83_vm0, %v80_v9  ;;  %1841 = vset.pattern.permute.xlu0 %v2017_v11 }
  0x32   :  { %1840 = vset.pattern.permute.xlu1 %v2017_v11  ;;  %378 = vperm.xlu0 %1841, %v342_v2  }
  0x33   :  { %382 = vperm.xlu1 %1840, %v343_v1   ;;  %1717 = vmatprep.mubr.msk.f32.mxu0 %vm83_vm0, %v81_v10  ;;  %v2019_v1 = vmov 2475754826   ;;  %v2020_v10 = vmov 2131351028  }
  0x35   :  { %1718 = vmatmul.mubr.msk.f32.gmra.mxu0 %vm83_vm0, %v82_v12  ;;  %v2021_v12 = vmov 2102212464  }
  0x36   :  { %1843 = vset.pattern.permute.xlu0 %v2015_v0 }
  0x37   :  { %1842 = vset.pattern.permute.xlu1 %v2015_v0 }
  0x38   :  { %400 = vperm.xlu1 %1842, %v394_v13  }
  0x3c   :  { %397 = vperm.xlu1 %1842, %v393_v14   ;;  %v2022_v14 = vmov 920167782  }
  0xa2   :  { %v353_v21 = vpop.permute.xlu0 %352  ;;  %v348_v22 = vpop.permute.xlu1 %347 }
  0xa3   :  { %v359_v26 = vmul.f32 %v358_v23, %v348_v22  ;;  %v360_v29 = vmul.f32 %v358_v23, %v353_v21  ;;  %v2023_v22 = vmov 1326507024  }
  0xa8   :  { %v367_v27 = vpop.permute.xlu0 %366  ;;  %v363_v28 = vpop.permute.xlu1 %362 }
  0xa9   :  { %v374_v30 = vmul.f32 %v372_v24, %v367_v27  ;;  %v373_v31 = vmul.f32 %v372_v24, %v363_v28 }
  0xab   :  { %v375_v33 = vadd.f32 %v373_v31, %v359_v26  ;;  %v376_v34 = vadd.f32 %v374_v30, %v360_v29 }
  0xad   :  { %v379_v35 = vpop.permute.xlu0 %378 }
  0xae   :  { %v389_v36 = vmul.f32 %v388_v32, %v379_v35  ;;  %v383_v37 = vpop.permute.xlu1 %382 }
  0xaf   :  { %v390_v38 = vmul.f32 %v388_v32, %v383_v37 }
  0xb0   :  { %v2158_v39 = vadd.f32 %v389_v36, %v375_v33 }
  0xb1   :  { %v2160_v40 = vadd.f32 %v390_v38, %v376_v34 }
  0xb2   :  { %v413_v41 = vand.u32 2139095040, %v2158_v39  ;;  %v410_v47 = vand.u32 2147483647, %v2158_v39 }
  0xb3   :  { %v516_v42 = vand.u32 2139095040, %v2160_v40  ;;  %v513_v43 = vand.u32 2147483647, %v2160_v40  ;;  %vm515_vm15 = vcmp.lt.s32.totalorder %v2160_v40, 0 }
  0xb4   :  { %v414_v44 = vshrl.u32 %v413_v41, 23  ;;  %v2170_v53 = vand.u32 8388607, %v410_v47 }
  0xb5   :  { %v517_v45 = vshrl.u32 %v516_v42, 23  ;;  %v520_v46 = vand.u32 8388607, %v513_v43 }
  0xb6   :  { %v1602_v48 = vadd.s32 4294967169, %v414_v44  ;;  %v418_v60 = vor.u32 8388608, %v2170_v53 }
  0xb7   :  { %v1606_v49 = vadd.s32 4294967169, %v517_v45  ;;  %v521_v52 = vor.u32 8388608, %v520_v46 }
  0xb8   :  { %v420_v50 = vadd.s32 1, %v1602_v48 }
  0xb9   :  { %v523_v51 = vadd.s32 1, %v1606_v49  ;;  %v2172_v59 = vshll.u32 %v521_v52, 8 }
  0xba   :  { %vm421_vm1 = vcmp.gt.s32.totalorder %v420_v50, 0 }
  0xbb   :  { %v422_v54 = vsel %vm421_vm1, %v420_v50, 0  ;;  %vm524_vm2 = vcmp.gt.s32.totalorder %v523_v51, 0  ;;  %vm2231_vm1 = vcmp.le.f32.partialorder %v513_v43, 0.7853982 }
  0xbc   :  { %v424_v55 = vand.u32 31, %v422_v54  ;;  %v525_v56 = vsel %vm524_vm2, %v523_v51, 0  ;;  %v2175_v61 = vshrl.u32 %v422_v54, 5  ;;  %vm412_vm2 = vcmp.lt.s32.totalorder %v2158_v39, 0 }
  0xbd   :  { %v526_v57 = vshrl.u32 %v525_v56, 5  ;;  %v527_v58 = vand.u32 31, %v525_v56 }
  0xbe   :  { %v425_v62 = vsub.s32 32, %v424_v55  ;;  %v427_v0 = vshll.u32 %v2018_v63, %v424_v55  ;;  %v430_v2 = vshll.u32 %v2019_v1, %v424_v55  ;;  %v433_v16 = vshll.u32 %v2020_v10, %v424_v55 }
  0xbf   :  { %v528_v5 = vsub.s32 32, %v527_v58  ;;  %v530_v7 = vshll.u32 %v2018_v63, %v527_v58  ;;  %v533_v9 = vshll.u32 %v2019_v1, %v527_v58  ;;  %v536_v11 = vshll.u32 %v2020_v10, %v527_v58 }
  0xc0   :  { %v539_v13 = vshll.u32 %v2021_v12, %v527_v58  ;;  %v542_v15 = vshll.u32 %v2022_v14, %v527_v58  ;;  %vm545_vm3 = vcmp.lt.s32.totalorder %v526_v57, 1  ;;  %vm546_vm4 = vcmp.lt.s32.totalorder %v526_v57, 2 }
  0xc1   :  { %v529_v17 = vshrl.u32 %v2018_v63, %v528_v5  ;;  %v531_v18 = vshrl.u32 %v2019_v1, %v528_v5  ;;  %v534_v19 = vshrl.u32 %v2020_v10, %v528_v5  ;;  %v537_v20 = vshrl.u32 %v2021_v12, %v528_v5 }
  0xc2   :  { %v540_v21 = vshrl.u32 %v2022_v14, %v528_v5  ;;  %v543_v23 = vshrl.u32 %v2023_v22, %v528_v5  ;;  %vm547_vm5 = vcmp.lt.s32.totalorder %v526_v57, 3  ;;  %vm548_vm6 = vcmp.lt.s32.totalorder %v526_v57, 4 }
  0xc3   :  { %v532_v24 = vor.u32 %v531_v18, %v530_v7  ;;  %v535_v25 = vor.u32 %v534_v19, %v533_v9  ;;  %v538_v26 = vor.u32 %v537_v20, %v536_v11  ;;  %v428_v29 = vshrl.u32 %v2019_v1, %v425_v62 }
  0xc4   :  { %v541_v27 = vor.u32 %v540_v21, %v539_v13  ;;  %v544_v28 = vor.u32 %v543_v23, %v542_v15  ;;  %v431_v30 = vshrl.u32 %v2020_v10, %v425_v62  ;;  %v426_v38 = vshrl.u32 %v2018_v63, %v425_v62 }
  0xc5   :  { %v549_v31 = vsel %vm545_vm3, %v529_v17, %v532_v24  ;;  %v550_v32 = vsel %vm548_vm6, %v538_v26, 2102212464  ;;  %v553_v33 = vsel %vm545_vm3, %v532_v24, %v535_v25  ;;  %v557_v34 = vsel %vm545_vm3, %v535_v25, %v538_v26 }
  0xc6   :  { %v551_v35 = vsel %vm547_vm5, %v535_v25, %v550_v32  ;;  %v554_v36 = vsel %vm548_vm6, %v541_v27, 920167782  ;;  %v558_v37 = vsel %vm548_vm6, %v544_v28, 1326507024  ;;  %v429_v45 = vor.u32 %v428_v29, %v427_v0 }
  0xc7   :  { %v552_v41 = vsel %vm546_vm4, %v549_v31, %v551_v35  ;;  %v555_v42 = vsel %vm547_vm5, %v538_v26, %v554_v36  ;;  %v559_v44 = vsel %vm547_vm5, %v541_v27, %v558_v37  ;;  %v432_v49 = vor.u32 %v431_v30, %v430_v2 }
  0xc8   :  { %v556_v46 = vsel %vm546_vm4, %v553_v33, %v555_v42  ;;  %v560_v48 = vsel %vm546_vm4, %v557_v34, %v559_v44  ;;  %v434_v50 = vshrl.u32 %v2021_v12, %v425_v62  ;;  %v436_v58 = vshll.u32 %v2021_v12, %v424_v55 }
  0xc9   :  { %v2187_v51 = vmul.u32.u64.low %v2172_v59, %v560_v48  ;;  %v2188_v52 = vmul.u32.u64.high %v2172_v59, %v560_v48, %v2187_v51  ;;  %v2191_v53 = vmul.u32.u64.low %v2172_v59, %v556_v46  ;;  %v2192_v54 = vmul.u32.u64.high %v2172_v59, %v556_v46, %v2191_v53 }
  0xca   :  { %v435_v56 = vor.u32 %v434_v50, %v433_v16  ;;  %v437_v63 = vshrl.u32 %v2022_v14, %v425_v62  ;;  %v439_v1 = vshll.u32 %v2022_v14, %v424_v55  ;;  %v568_v0 = vmul.u32 %v2172_v59, %v552_v41 }
  0xcb   :  { %v440_v5 = vshrl.u32 %v2023_v22, %v425_v62  ;;  %vm442_vm7 = vcmp.lt.s32.totalorder %v2175_v61, 1  ;;  %v458_v57 = vshll.u32 %v418_v60, 8  ;;  %vm443_vm8 = vcmp.lt.s32.totalorder %v2175_v61, 2 }
  0xcc   :  { %v438_v2 = vor.u32 %v437_v63, %v436_v58  ;;  %vm444_vm9 = vcmp.lt.s32.totalorder %v2175_v61, 3  ;;  %vm445_vm10 = vcmp.lt.s32.totalorder %v2175_v61, 4  ;;  %vm570_vm11 = vc.u32 %v2188_v52, %v2191_v53 }
  0xcd   :  { %v571_v7 = vadd.s32 1, %v2192_v54  ;;  %v441_v9 = vor.u32 %v440_v5, %v439_v1  ;;  %v450_v10 = vsel %vm442_vm7, %v429_v45, %v432_v49  ;;  %v446_v55 = vsel %vm442_vm7, %v426_v38, %v429_v45 }
  0xce   :  { %v447_v11 = vsel %vm445_vm10, %v435_v56, 2102212464  ;;  %v451_v59 = vsel %vm445_vm10, %v438_v2, 920167782  ;;  %v454_v62 = vsel %vm442_vm7, %v432_v49, %v435_v56  ;;  %v569_v41 = vadd.s32 %v2191_v53, %v2188_v52 }
  0xcf   :  { %v572_v12 = vsel %vm570_vm11, %v571_v7, %v2192_v54  ;;  %v448_v60 = vsel %vm444_vm9, %v432_v49, %v447_v11  ;;  %v452_v13 = vsel %vm444_vm9, %v435_v56, %v451_v59  ;;  %v455_v14 = vsel %vm445_vm10, %v441_v9, 1326507024 }
  0xd0   :  { %v573_v15 = vadd.s32 %v572_v12, %v568_v0  ;;  %v453_v16 = vsel %vm443_vm8, %v450_v10, %v452_v13  ;;  %v456_v17 = vsel %vm444_vm9, %v438_v2, %v455_v14  ;;  %v449_v18 = vsel %vm443_vm8, %v446_v55, %v448_v60 }
  0xd1   :  { %v457_v19 = vsel %vm443_vm8, %v454_v62, %v456_v17  ;;  %v2214_v20 = vmul.u32.u64.low %v458_v57, %v453_v16  ;;  %v2215_v21 = vmul.u32.u64.high %v458_v57, %v453_v16, %v2214_v20  ;;  %v465_v26 = vmul.u32 %v458_v57, %v449_v18 }
  0xd2   :  { %v574_v22 = vadd.s32 536870912, %v573_v15  ;;  %v2217_v23 = vmul.u32.u64.low %v458_v57, %v457_v19  ;;  %v2218_v24 = vmul.u32.u64.high %v458_v57, %v457_v19, %v2217_v23  ;;  %vm411_vm3 = vcmp.le.f32.partialorder %v410_v47, 0.7853982 }
  0xd3   :  { %v468_v27 = vadd.s32 1, %v2215_v21  ;;  %vm618_vm7 = vcmask 130048   ;;  %vm605_vm11 = vweird.f32 %v2160_v40 }
  0xd4   :  { %v575_v25 = vshrl.u32 %v574_v22, 30  ;;  %vm467_vm12 = vc.u32 %v2218_v24, %v2214_v20  ;;  %v466_v5 = vadd.s32 %v2214_v20, %v2218_v24 }
  0xd5   :  { %v469_v29 = vsel %vm467_vm12, %v468_v27, %v2215_v21 }
  0xd6   :  { %v576_v28 = vshll.u32 %v575_v25, 30  ;;  %v470_v31 = vadd.s32 %v469_v29, %v465_v26  ;;  %v599_v62 = vsub.s32 4, %v575_v25 }
  0xd8   :  { %v577_v30 = vsub.s32 %v573_v15, %v576_v28  ;;  %v471_v32 = vadd.s32 536870912, %v470_v31  ;;  %v600_v20 = vsel %vm515_vm15, %v599_v62, %v575_v25 }
  0xd9   :  { %v602_v26 = vsel %vm2231_vm1, 0, %v600_v20 }
  0xda   :  { %v579_v61 = vsub.s32 0, %v577_v30  ;;  %v2223_v34 = vshrl.u32 %v471_v32, 30 }
  0xdc   :  { %v1607_v33 = vmin.u32 %v579_v61, %v577_v30  ;;  %v473_v36 = vshll.u32 %v2223_v34, 30  ;;  %v496_v25 = vsub.s32 4, %v2223_v34 }
  0xde   :  { %v581_v35 = vclz %v1607_v33  ;;  %v474_v38 = vsub.s32 %v470_v31, %v473_v36  ;;  %v497_v61 = vsel %vm412_vm2, %v496_v25, %v2223_v34  ;;  %v606_v33 = vand.u32 3, %v602_v26 }
  0xe0   :  { %v1608_v37 = vadd.s32 4294967294, %v581_v35  ;;  %v476_v44 = vsub.s32 0, %v474_v38  ;;  %v2262_v35 = vpop.permute.xlu1 %400  ;;  %vm611_vm4 = vcmp.eq.s32.totalorder %v606_v33, 2  ;;  %vm607_vm6 = vcmp.lt.s32.totalorder %v606_v33, 2 }
  0xe1   :  { %vm608_vm8 = vcmp.eq.s32.totalorder %v606_v33, 0 }
  0xe2   :  { %vm1609_vm13 = vcmp.lt.s32.totalorder %v1608_v37, 0  ;;  %v1603_v49 = vmin.u32 %v476_v44, %v474_v38  ;;  %v2267_v44 = vld [vmem:[%s2369_s1] ss:$0 sm:$0xff]  ;;  %s2024_s1 = smov 16  }
  0xe3   :  { %v584_v42 = vsel %vm1609_vm13, 0, %v1608_v37  ;;  %v499_v37 = vsel %vm411_vm3, 0, %v497_v61  ;;  %vm407_vm12 = vcmp.eq.s32.totalorder %v2262_v35, %v2267_v44 }
  0xe4   :  { %v585_v45 = vsub.s32 32, %v584_v42  ;;  %v586_v46 = vshll.u32 %v577_v30, %v584_v42  ;;  %v589_v48 = vsub.s32 4294967266, %v584_v42  ;;  %v478_v54 = vclz %v1603_v49 }
  0xe5   :  { %v818_v30 = vadd.s32 3, %v602_v26  ;;  %v714_v47 = vadd.s32 3, %v499_v37 }
  0xe6   :  { %v587_v50 = vshrl.u32 %v569_v41, %v585_v45  ;;  %v590_v51 = vadd.s32 127, %v589_v48  ;;  %v1604_v63 = vadd.s32 4294967294, %v478_v54  ;;  %v398_v48 = vpop.permute.xlu1 %397 }
  0xe7   :  { %v819_v36 = vand.u32 3, %v818_v30  ;;  %vm406_vm13 = vcmp.eq.s32.totalorder %v398_v48, %v2267_v44 }
  0xe8   :  { %v588_v56 = vor.u32 %v587_v50, %v586_v46  ;;  %v591_v58 = vshll.u32 %v590_v51, 23  ;;  %vm1605_vm14 = vcmp.lt.s32.totalorder %v1604_v63, 0  ;;  %v503_v46 = vand.u32 3, %v499_v37 }
  0xe9   :  { %v481_v52 = vsel %vm1605_vm14, 0, %v1604_v63  ;;  %vm824_vm5 = vcmp.eq.s32.totalorder %v819_v36, 2  ;;  %vm820_vm9 = vcmp.lt.s32.totalorder %v819_v36, 2  ;;  %vm821_vm10 = vcmp.eq.s32.totalorder %v819_v36, 0 }
  0xea   :  { %v592_v1 = vor.u32 4788187, %v591_v58  ;;  %v595_v0 = vcvt.s32.f32 %v588_v56  ;;  %v482_v53 = vsub.s32 32, %v481_v52  ;;  %v483_v2 = vshll.u32 %v474_v38, %v481_v52 }
  0xeb   :  { %v486_v7 = vsub.s32 4294967266, %v481_v52  ;;  %v715_v63 = vand.u32 3, %v714_v47  ;;  %vm508_vm14 = vcmp.eq.s32.totalorder %v503_v46, 2 }
  0xec   :  { %v593_v57 = vand.u32 2147483647, %v592_v1  ;;  %v484_v10 = vshrl.u32 %v466_v5, %v482_v53 }
  0xed   :  { %v487_v55 = vadd.s32 127, %v486_v7 }
  0xee   :  { %v596_v9 = vmul.f32 %v595_v0, %v593_v57  ;;  %v485_v60 = vor.u32 %v484_v10, %v483_v2 }
  0xef   :  { %v488_v13 = vshll.u32 %v487_v55, 23 }
  0xf0   :  { %v597_v59 = vxor.u32 2147483648, %v596_v9  ;;  %v492_v18 = vcvt.s32.f32 %v485_v60  ;;  %v408_v60 = vsel %vm406_vm13, %v2158_v39, 0.0 }
  0xf1   :  { %v2235_v12 = vpop.f32.mrf.mxu0  ;;  %v489_v17 = vor.u32 4788187, %v488_v13 }
  0xf2   :  { %v1590_v14 = vmul.f32 -1.442695, %v2235_v12  ;;  %v598_v15 = vsel %vm515_vm15, %v597_v59, %v596_v9  ;;  %vm720_vm15 = vcmp.eq.s32.totalorder %v715_v63, 2 }
  0xf3   :  { %v2240_v16 = vpop.f32.mrf.mxu0  ;;  %v601_v43 = vsel %vm2231_vm1, %v2160_v40, %v598_v15  ;;  %v490_v22 = vand.u32 2147483647, %v489_v17  ;;  %vm505_vm1 = vcmp.eq.s32.totalorder %v503_v46, 0 }
  0xf4   :  { %1844 = vpow2.f32 %v1590_v14  ;;  %v1589_v19 = vmul.f32 -1.442695, %v2240_v16 }
  0xf5   :  { %v2248_v21 = vpop.f32.mrf.mxu0  ;;  %1846 = vcosq.f32 %v601_v43  ;;  %v493_v27 = vmul.f32 %v492_v18, %v490_v22 }
  0xf6   :  { %1848 = vpow2.f32 %v1589_v19  ;;  %v1592_v23 = vmul.f32 -1.442695, %v2248_v21 }
  0xf7   :  { %v2251_v24 = vpop.f32.mrf.mxu0  ;;  %1850 = vsinq.f32 %v601_v43  ;;  %v494_v29 = vxor.u32 2147483648, %v493_v27 }
  0xf8   :  { %1852 = vpow2.f32 %v1592_v23  ;;  %v1591_v28 = vmul.f32 -1.442695, %v2251_v24 }
  0xf9   :  { %v495_v31 = vsel %vm412_vm2, %v494_v29, %v493_v27  ;;  %vm717_vm2 = vcmp.eq.s32.totalorder %v715_v63, 0 }
  0xfa   :  { %1854 = vpow2.f32 %v1591_v28  ;;  %v498_v32 = vsel %vm411_vm3, %v2158_v39, %v495_v31  ;;  %vm504_vm3 = vcmp.lt.s32.totalorder %v503_v46, 2 }
  0xfb   :  { %1856 = vcosq.f32 %v498_v32 }
  0xfc   :  { %1858 = vsinq.f32 %v498_v32 }
 0x101   :  { %v1845_v38 = vpop.eup %1844 }
 0x102   :  { %v1847_v41 = vpop.eup %1846  ;;  %v194_v50 = vadd.f32 1.0, %v1845_v38 }
 0x103   :  { %v1849_v42 = vpop.eup %1848  ;;  %v612_v34 = vxor.u32 2147483648, %v1847_v41 }
 0x104   :  { %v1851_v45 = vpop.eup %1850  ;;  %v193_v0 = vadd.f32 1.0, %v1849_v42 }
 0x105   :  { %v1853_v49 = vpop.eup %1852  ;;  %v609_v51 = vxor.u32 2147483648, %v1851_v45  ;;  %v613_v54 = vsel %vm611_vm4, %v612_v34, %v1851_v45  ;;  %v826_v56 = vsel %vm824_vm5, %v612_v34, %v1851_v45  ;;  %vm716_vm4 = vcmp.lt.s32.totalorder %v715_v63, 2 }
 0x106   :  { %v196_v58 = vadd.f32 1.0, %v1853_v49  ;;  %vm502_vm5 = vweird.f32 %v2158_v39  ;;  %v409_v39 = vsel %vm407_vm12, %v2160_v40, 0.0  ;;  %v210_v40 = vld [vmem:[%s2375_s7 + $0x8] sm:$0xff] }
 0x107   :  { %v1855_v1 = vpop.eup %1854  ;;  %v610_v5 = vsel %vm608_vm8, %v1847_v41, %v609_v51  ;;  %v823_v57 = vsel %vm821_vm10, %v1847_v41, %v609_v51 }
 0x108   :  { %1860 = vrcp.f32 %v196_v58  ;;  %v195_v52 = vadd.f32 1.0, %v1855_v1  ;;  %v614_v53 = vsel %vm607_vm6, %v610_v5, %v613_v54  ;;  %v827_v2 = vsel %vm820_vm9, %v823_v57, %v826_v56  ;;  %v1857_v10 = vpop.eup %1856 }
 0x109   :  { %1862 = vrcp.f32 %v194_v50  ;;  %v615_v7 = vsel %vm605_vm11, nan, %v614_v53  ;;  %v828_v9 = vsel %vm605_vm11, nan, %v827_v2  ;;  %v1859_v59 = vpop.eup %1858  ;;  %v509_v62 = vxor.u32 2147483648, %v1857_v10 }
 0x10a   :  { %1864 = vrcp.f32 %v195_v52  ;;  %v617_v55 = vsel %vm407_vm12, %v615_v7, 0.0  ;;  %v830_v11 = vsel %vm407_vm12, %v828_v9, 0.0  ;;  %v506_v13 = vxor.u32 2147483648, %v1859_v59 }
 0x10b   :  { %620 = vst.msk [vmem:[#allocation2 + $0x8] sm:$0xff] %vm618_vm7, %v617_v55  ;;  %835 = vrot.lane.b32.xlu0 %v830_v11, %s2024_s1  ;;  %1866 = vrcp.f32 %v193_v0  ;;  %v510_v14 = vsel %vm508_vm14, %v509_v62, %v1859_v59  ;;  %v722_v15 = vsel %vm720_vm15, %v509_v62, %v1859_v59  ;;  %vm839_vm6 = vcmask 261248  }
 0x10c   :  { %v507_v43 = vsel %vm505_vm1, %v1857_v10, %v506_v13  ;;  %v719_v17 = vsel %vm717_vm2, %v1857_v10, %v506_v13  ;;  %v1044_v13 = vld [vmem:[#allocation6 + $0x10] sm:$0xff] }
 0x10d   :  { %v511_v18 = vsel %vm504_vm3, %v507_v43, %v510_v14  ;;  %v723_v19 = vsel %vm716_vm4, %v719_v17, %v722_v15  ;;  %v943_v15 = vld [vmem:[%s2373_s5 + $0x10] sm:$0xff] }
 0x10e   :  { %v512_v20 = vsel %vm502_vm5, nan, %v511_v18  ;;  %v724_v22 = vsel %vm502_vm5, nan, %v723_v19  ;;  %v942_v19 = vld [vmem:[%s2373_s5 + $0x8] sm:$0xff] }
 0x10f   :  { %1546 = vrot.lane.b32.xlu0 %v408_v60, %s2025_s11  ;;  %v616_v23 = vsel %vm406_vm13, %v512_v20, 0.0  ;;  %v829_v26 = vsel %vm406_vm13, %v724_v22, 0.0  ;;  %v941_v22 = vld [vmem:[%s2373_s5] sm:$0xff] }
 0x110   :  { %619 = vst.msk [vmem:[#allocation2] sm:$0xff] %vm618_vm7, %v616_v23  ;;  %833 = vrot.lane.b32.xlu1 %v829_v26, %s2024_s1  ;;  %v1042_v26 = vld [vmem:[#allocation6] sm:$0xff] }
 0x114   :  { %1548 = vrot.lane.b32.xlu1 %v409_v39, %s2025_s11 }
 0x115   :  { %v1861_v27 = vpop.eup %1860 }
 0x116   :  { %v1863_v28 = vpop.eup %1862  ;;  %v208_v25 = vmul.f32 %v1861_v27, %v2248_v21  ;;  %v211_v21 = vld [vmem:[%s2375_s7 + $0x10] sm:$0xff] }
 0x117   :  { %v1865_v29 = vpop.eup %1864  ;;  %v206_v61 = vmul.f32 %v1863_v28, %v2235_v12  ;;  %v212_v12 = vld [vmem:[%s2375_s7 + $0x18] sm:$0xff]  ;;  %v1144_v28 = vld [vmem:[#allocation8 + $0x18] sm:$0xff] }
 0x118   :  { %v207_v30 = vmul.f32 %v1865_v29, %v2251_v24  ;;  %1720 = vmatprep.subr.mxu1 %v208_v25  ;;  %v1867_v31 = vpop.eup %1866  ;;  %v1142_v29 = vld [vmem:[#allocation8 + $0x8] sm:$0xff] }
 0x119   :  { %1721 = vmatpush3.msra.mxu1 %v208_v25  ;;  %v205_v32 = vmul.f32 %v1867_v31, %v2240_v16  ;;  %v1143_v25 = vld [vmem:[#allocation8 + $0x10] sm:$0xff] }
 0x11a   :  { %1722 = vmatprep.subr.mxu1 %v207_v30 }
 0x11b   :  { %1723 = vmatpush3.msra.mxu1 %v207_v30  ;;  %v1141_v30 = vld [vmem:[#allocation8] sm:$0xff] }
 0x11c   :  { %1724 = vmatprep.subr.mxu1 %v206_v61 }
 0x11d   :  { %1725 = vmatpush3.msra.mxu1 %v206_v61 }
 0x11e   :  { %1726 = vmatprep.subr.mxu1 %v205_v32 }
 0x11f   :  { %1727 = vmatpush3.msra.mxu1 %v205_v32 }
 0x120   :  { %1729 = vmatmul.mubr.msk.f32.vlgmr.msra.gmra.mxu1 %vm83_vm0, %v210_v40 }
 0x121   :  { %1731 = vmatprep.mubr.msk.f32.mxu1 %vm83_vm0, %v211_v21 }
 0x124   :  { %1732 = vmatmul.mubr.msk.f32.gmra.mxu1 %vm83_vm0, %v212_v12 }
 0x17d   :  { %v836_v16 = vpop.permute.xlu0 %835 }
 0x17e   :  { %841 = vst.msk [vmem:[#allocation2 + $0x8] sm:$0xff] %vm839_vm6, %v836_v16 }
 0x181   :  { %v1547_v24 = vpop.permute.xlu0 %1546 }
 0x182   :  { %v1552_v33 = vadd.f32 %v1547_v24, %v408_v60  ;;  %v834_v35 = vpop.permute.xlu1 %833  ;;  %v1045_v60 = vld [vmem:[#allocation6 + $0x18] sm:$0xff] }
 0x183   :  { %840 = vst.msk [vmem:[#allocation2] sm:$0xff] %vm839_vm6, %v834_v35 }
 0x184   :  { %1558 = vrot.lane.b32.xlu0 %v1552_v33, %s2026_s2 }
 0x185   :  { %v2315_v36 = vld [vmem:[#allocation2 + $0x8] sm:$0xff] }
 0x186   :  { %1734 = vmatprep.subr.mxu0 %v2315_v36  ;;  %v1549_v37 = vpop.permute.xlu1 %1548 }
 0x187   :  { %1735 = vmatpush3.msra.mxu0 %v2315_v36  ;;  %v1553_v38 = vadd.f32 %v1549_v37, %v409_v39 }
 0x189   :  { %1560 = vrot.lane.b32.xlu1 %v1553_v38, %s2026_s2  ;;  %v1244_v38 = vld [vmem:[#allocation8 + $0x38] sm:$0xff] }
 0x18a   :  { %v842_v41 = vld [vmem:[#allocation2] sm:$0xff] }
 0x18b   :  { %1736 = vmatprep.subr.mxu0 %v842_v41  ;;  %1752 = vmatprep.mubr.msk.f32.mxu1 %vm83_vm0, %v842_v41 }
 0x18c   :  { %1737 = vmatpush3.msra.mxu0 %v842_v41  ;;  %v1243_v41 = vld [vmem:[#allocation8 + $0x30] sm:$0xff] }
 0x18d   :  { %1755 = vmatprep.subr.mxu0 %v1045_v60 }
 0x1e0   :  { %v1730_v47 = vpop.f32.mrf.mxu1 }
 0x1e1   :  { %v1598_v42 = vmul.f32 -1.442695, %v1730_v47 }
 0x1e2   :  { %v291_v44 = vpop.f32.mrf.mxu1 }
 0x1e3   :  { %1868 = vpow2.f32 %v1598_v42  ;;  %v1597_v34 = vmul.f32 -1.442695, %v291_v44  ;;  %v1241_v42 = vld [vmem:[#allocation8 + $0x20] sm:$0xff] }
 0x1e4   :  { %v1733_v45 = vpop.f32.mrf.mxu1 }
 0x1e5   :  { %1870 = vpow2.f32 %v1597_v34  ;;  %v1600_v46 = vmul.f32 -1.442695, %v1733_v45 }
 0x1e6   :  { %v301_v48 = vpop.f32.mrf.mxu1 }
 0x1e7   :  { %1872 = vpow2.f32 %v1600_v46  ;;  %v1599_v49 = vmul.f32 -1.442695, %v301_v48 }
 0x1e9   :  { %1874 = vpow2.f32 %v1599_v49 }
 0x1f0   :  { %v1869_v50 = vpop.eup %1868 }
 0x1f1   :  { %v323_v51 = vadd.f32 1.0, %v1869_v50 }
 0x1f2   :  { %v1871_v54 = vpop.eup %1870 }
 0x1f3   :  { %1876 = vrcp.f32 %v323_v51  ;;  %v322_v56 = vadd.f32 1.0, %v1871_v54 }
 0x1f4   :  { %v1873_v58 = vpop.eup %1872 }
 0x1f5   :  { %1878 = vrcp.f32 %v322_v56  ;;  %v325_v63 = vadd.f32 1.0, %v1873_v58 }
 0x1f6   :  { %v1875_v1 = vpop.eup %1874 }
 0x1f7   :  { %1880 = vrcp.f32 %v325_v63  ;;  %v324_v0 = vadd.f32 1.0, %v1875_v1  ;;  %v1346_v1 = vld [vmem:[#allocation8 + $0x58] sm:$0xff] }
 0x1f9   :  { %1882 = vrcp.f32 %v324_v0  ;;  %v1345_v0 = vld [vmem:[#allocation8 + $0x50] sm:$0xff] }
 0x200   :  { %v1877_v5 = vpop.eup %1876 }
 0x201   :  { %v335_v52 = vmul.f32 %v1877_v5, %v1730_v47  ;;  %v1242_v47 = vld [vmem:[#allocation8 + $0x28] sm:$0xff] }
 0x202   :  { %v1879_v57 = vpop.eup %1878  ;;  %v1344_v5 = vld [vmem:[#allocation8 + $0x48] sm:$0xff] }
 0x203   :  { %v334_v53 = vmul.f32 %v1879_v57, %v291_v44  ;;  %v339_v10 = vadd.f32 %v335_v52, %v2122_v6  ;;  %v1343_v57 = vld [vmem:[#allocation8 + $0x40] sm:$0xff] }
 0x204   :  { %v1881_v2 = vpop.eup %1880 }
 0x205   :  { %v338_v7 = vadd.f32 %v334_v53, %v2131_v8  ;;  %v337_v55 = vmul.f32 %v1881_v2, %v1733_v45  ;;  %v1043_v8 = vld [vmem:[#allocation6 + $0x8] sm:$0xff] }
 0x206   :  { %v1883_v9 = vpop.eup %1882 }
 0x207   :  { %v336_v11 = vmul.f32 %v1883_v9, %v301_v48  ;;  %1738 = vmatprep.mubr.msk.f32.mxu0 %vm618_vm7, %v338_v7  ;;  %v341_v62 = vadd.f32 %v337_v55, %v2107_v3 }
 0x208   :  { %1739 = vmatmul.mubr.msk.f32.vlgmr.msra.gmra.mxu0 %vm618_vm7, %v339_v10 }
 0x209   :  { %v340_v59 = vadd.f32 %v336_v11, %v2112_v4  ;;  %1756 = vmatpush3.msra.mxu0 %v1045_v60  ;;  %v944_v4 = vld [vmem:[%s2373_s5 + $0x18] sm:$0xff]  ;;  %s2027_s5 = smov [#allocation9]  }
 0x20a   :  { %1757 = vmatprep.subr.mxu0 %v1044_v13  ;;  %s1572_s4 = sshll.u32 %s2027_s5, 4  ;;  %s1573_s4 = int_to_ptr.vmem [resolvable:$true] %s1572_s4 }
 0x20b   :  { %1741 = vmatprep.mubr.msk.f32.mxu0 %vm618_vm7, %v340_v59  ;;  %1758 = vmatpush3.msra.mxu0 %v1044_v13  ;;  %s1984_s26 = scalar_lea.vmem %s1573_s4, 256  ;;  %p1989_p2 = scmp.lt.s32.totalorder %s1573_s4, %s1573_s4 }
 0x20c   :  { %1742 = vmatmul.mubr.msk.f32.gmra.mxu0 %vm618_vm7, %v341_v62  ;;  %1759 = vmatprep.subr.mxu0 %v1043_v8  ;;  %vm1564_vm7 = vcmask 326912   ;;  %p1985_p1 = scmp.ne.s32.totalorder %s1573_s4, %s1984_s26  ;;  %p1990_p3 = scmp.lt.s32.totalorder %s1984_s26, %s1984_s26 }
 0x20d   :  { %1760 = vmatpush3.msra.mxu0 %v1043_v8 }
 0x20e   :  { %1761 = vmatprep.subr.mxu0 %v1042_v26  ;;  %p1991_p4 = por %p1990_p3, %p1989_p2 }
 0x20f   :  { %1762 = vmatpush3.msra.mxu0 %v1042_v26 }
 0x210   :  { %1766 = vmatprep.subr.mxu0 %v1144_v28  ;;  %p1992_p5 = pnand %p1991_p4, %p1985_p1 }
 0x2c8   :  { %v1740_v6 = vpop.f32.mrf.mxu0 }
 0x2c9   :  { %v946_v20 = vmul.f32 %v1740_v6, %v942_v19 }
 0x2ca   :  { %v922_v14 = vpop.f32.mrf.mxu0 }
 0x2cb   :  { %v945_v23 = vmul.f32 %v941_v22, %v922_v14  ;;  %v1446_v14 = vld [vmem:[#allocation8 + $0x78] sm:$0xff] }
 0x2cc   :  { %v1743_v3 = vpop.f32.mrf.mxu0 }
 0x2cd   :  { %v948_v43 = vmul.f32 %v1743_v3, %v944_v4  ;;  %v1445_v4 = vld [vmem:[#allocation8 + $0x70] sm:$0xff]  ;;  %v1444_v3 = vld [vmem:[#allocation8 + $0x68] sm:$0xff] }
 0x2ce   :  { %v932_v17 = vpop.f32.mrf.mxu0 }
 0x2cf   :  { %v947_v18 = vmul.f32 %v943_v15, %v932_v17  ;;  %1744 = vmatprep.subr.msk.mxu1 %vm83_vm0, %v948_v43  ;;  %v1443_v15 = vld [vmem:[#allocation8 + $0x60] sm:$0xff] }
 0x2d0   :  { %1745 = vmatpush3.xpose.msk.msra.mxu1 %vm83_vm0, %v948_v43 }
 0x2d1   :  { %1746 = vmatprep.subr.msk.mxu1 %vm83_vm0, %v947_v18 }
 0x2d4   :  { %1747 = vmatpush3.xpose.msk.msra.mxu1 %vm83_vm0, %v947_v18 }
 0x2d5   :  { %1748 = vmatprep.subr.msk.mxu1 %vm83_vm0, %v946_v20 }
 0x2d8   :  { %1749 = vmatpush3.xpose.msk.msra.mxu1 %vm83_vm0, %v946_v20 }
 0x2d9   :  { %1750 = vmatprep.subr.msk.mxu1 %vm83_vm0, %v945_v23 }
 0x2dc   :  { %1751 = vmatpush3.xpose.msk.msra.mxu1 %vm83_vm0, %v945_v23 }
 0x2dd   :  { %1777 = vmatprep.subr.mxu1 %v1244_v38 }
 0x2df   :  { %1753 = vmatmul.mubr.msk.f32.vlgmr.msra.gmra.mxu1 %vm83_vm0, %v2315_v36 }
 0x2e0   :  { %1778 = vmatpush3.msra.mxu1 %v1244_v38 }
 0x2e1   :  { %1779 = vmatprep.subr.mxu1 %v1243_v41 }
 0x2e2   :  { %1780 = vmatpush3.msra.mxu1 %v1243_v41  ;;  %v1559_v41 = vpop.permute.xlu0 %1558 }
 0x2e3   :  { %1781 = vmatprep.subr.mxu1 %v1242_v47 }
 0x2e4   :  { %1782 = vmatpush3.msra.mxu1 %v1242_v47 }
 0x2e5   :  { %1783 = vmatprep.subr.mxu1 %v1241_v42 }
 0x2e6   :  { %1784 = vmatpush3.msra.mxu1 %v1241_v42 }
 0x2e7   :  { %1799 = vmatprep.subr.mxu1 %v1446_v14 }
 0x39f   :  { %v1754_v39 = vpop.f32.mrf.mxu1 }
 0x3a1   :  { %v1033_v27 = vpop.f32.mrf.mxu1 }
 0x3a2   :  { %1763 = vmatprep.mubr.msk.f32.mxu0 %vm83_vm0, %v1033_v27 }
 0x3a3   :  { %1764 = vmatmul.mubr.msk.f32.vlgmr.msra.gmra.mxu0 %vm83_vm0, %v1754_v39 }
 0x3a4   :  { %1767 = vmatpush3.msra.mxu0 %v1144_v28 }
 0x3a5   :  { %1768 = vmatprep.subr.mxu0 %v1143_v25 }
 0x3a6   :  { %1769 = vmatpush3.msra.mxu0 %v1143_v25 }
 0x3a7   :  { %1770 = vmatprep.subr.mxu0 %v1142_v29 }
 0x3a8   :  { %1771 = vmatpush3.msra.mxu0 %v1142_v29 }
 0x3a9   :  { %1772 = vmatprep.subr.mxu0 %v1141_v30 }
 0x3aa   :  { %1773 = vmatpush3.msra.mxu0 %v1141_v30 }
 0x3ab   :  { %1788 = vmatprep.subr.mxu0 %v1346_v1 }
 0x463   :  { %v1765_v31 = vpop.f32.mrf.mxu0 }
 0x464   :  { %v1631_v61 = vmul.f32 -1.442695, %v1765_v31 }
 0x465   :  { %v1118_v32 = vpop.f32.mrf.mxu0 }
 0x466   :  { %1884 = vpow2.f32 %v1631_v61  ;;  %v1630_v40 = vmul.f32 -1.442695, %v1118_v32 }
 0x468   :  { %1886 = vpow2.f32 %v1630_v40 }
 0x473   :  { %v1885_v21 = vpop.eup %1884 }
 0x474   :  { %v1134_v12 = vadd.f32 1.0, %v1885_v21 }
 0x475   :  { %v1887_v16 = vpop.eup %1886 }
 0x476   :  { %v1133_v24 = vadd.f32 1.0, %v1887_v16  ;;  %1888 = vrcp.f32 %v1134_v12 }
 0x478   :  { %1890 = vrcp.f32 %v1133_v24 }
 0x483   :  { %v1889_v33 = vpop.eup %1888 }
 0x484   :  { %v1140_v37 = vmul.f32 %v1889_v33, %v1765_v31 }
 0x485   :  { %v1891_v35 = vpop.eup %1890 }
 0x486   :  { %v1139_v36 = vmul.f32 %v1891_v35, %v1118_v32 }
 0x488   :  { %1774 = vmatprep.mubr.msk.f32.mxu0 %vm83_vm0, %v1139_v36 }
 0x489   :  { %1775 = vmatmul.mubr.msk.f32.vlgmr.msra.gmra.mxu0 %vm83_vm0, %v1140_v37 }
 0x48a   :  { %1789 = vmatpush3.msra.mxu0 %v1346_v1 }
 0x48b   :  { %1790 = vmatprep.subr.mxu0 %v1345_v0 }
 0x48c   :  { %1791 = vmatpush3.msra.mxu0 %v1345_v0 }
 0x48d   :  { %1792 = vmatprep.subr.mxu0 %v1344_v5 }
 0x48e   :  { %1793 = vmatpush3.msra.mxu0 %v1344_v5 }
 0x48f   :  { %1794 = vmatprep.subr.mxu0 %v1343_v57 }
 0x490   :  { %1795 = vmatpush3.msra.mxu0 %v1343_v57 }
 0x549   :  { %v1776_v44 = vpop.f32.mrf.mxu0 }
 0x54a   :  { %v1635_v34 = vmul.f32 -1.442695, %v1776_v44 }
 0x54b   :  { %v1217_v45 = vpop.f32.mrf.mxu0 }
 0x54c   :  { %1892 = vpow2.f32 %v1635_v34  ;;  %v1634_v46 = vmul.f32 -1.442695, %v1217_v45 }
 0x54e   :  { %1894 = vpow2.f32 %v1634_v46 }
 0x559   :  { %v1893_v48 = vpop.eup %1892 }
 0x55a   :  { %v1233_v49 = vadd.f32 1.0, %v1893_v48 }
 0x55b   :  { %v1895_v50 = vpop.eup %1894 }
 0x55c   :  { %v1232_v51 = vadd.f32 1.0, %v1895_v50  ;;  %1896 = vrcp.f32 %v1233_v49 }
 0x55e   :  { %1898 = vrcp.f32 %v1232_v51 }
 0x569   :  { %v1897_v54 = vpop.eup %1896 }
 0x56a   :  { %v1239_v63 = vmul.f32 %v1897_v54, %v1776_v44 }
 0x56b   :  { %v1899_v56 = vpop.eup %1898 }
 0x56c   :  { %v1238_v58 = vmul.f32 %v1899_v56, %v1217_v45 }
 0x56e   :  { %1785 = vmatprep.mubr.msk.f32.mxu1 %vm83_vm0, %v1238_v58 }
 0x56f   :  { %1786 = vmatmul.mubr.msk.f32.vlgmr.msra.gmra.mxu1 %vm83_vm0, %v1239_v63 }
 0x570   :  { %1800 = vmatpush3.msra.mxu1 %v1446_v14 }
 0x571   :  { %1801 = vmatprep.subr.mxu1 %v1445_v4 }
 0x572   :  { %1802 = vmatpush3.msra.mxu1 %v1445_v4 }
 0x573   :  { %1803 = vmatprep.subr.mxu1 %v1444_v3 }
 0x574   :  { %1804 = vmatpush3.msra.mxu1 %v1444_v3 }
 0x575   :  { %1805 = vmatprep.subr.mxu1 %v1443_v15 }
 0x576   :  { %1806 = vmatpush3.msra.mxu1 %v1443_v15 }
 0x62f   :  { %v1787_v52 = vpop.f32.mrf.mxu1 }
 0x630   :  { %v1639_v53 = vmul.f32 -1.442695, %v1787_v52 }
 0x631   :  { %v1317_v2 = vpop.f32.mrf.mxu1 }
 0x632   :  { %1900 = vpow2.f32 %v1639_v53  ;;  %v1638_v7 = vmul.f32 -1.442695, %v1317_v2 }
 0x634   :  { %1902 = vpow2.f32 %v1638_v7 }
 0x63f   :  { %v1901_v9 = vpop.eup %1900 }
 0x640   :  { %v1333_v10 = vadd.f32 1.0, %v1901_v9 }
 0x641   :  { %v1903_v55 = vpop.eup %1902 }
 0x642   :  { %1904 = vrcp.f32 %v1333_v10  ;;  %v1332_v11 = vadd.f32 1.0, %v1903_v55 }
 0x644   :  { %1906 = vrcp.f32 %v1332_v11 }
 0x64f   :  { %v1905_v59 = vpop.eup %1904 }
 0x650   :  { %v1339_v60 = vmul.f32 %v1905_v59, %v1787_v52 }
 0x651   :  { %v1907_v62 = vpop.eup %1906 }
 0x652   :  { %v1338_v13 = vmul.f32 %v1907_v62, %v1317_v2  ;;  %v1341_v6 = vadd.f32 %v1339_v60, %v1140_v37  ;;  %v1561_v37 = vpop.permute.xlu1 %1560 }
 0x654   :  { %v1340_v8 = vadd.f32 %v1338_v13, %v1139_v36 }
 0x656   :  { %1796 = vmatprep.mubr.msk.f32.mxu0 %vm83_vm0, %v1340_v8 }
 0x657   :  { %1797 = vmatmul.mubr.msk.f32.vlgmr.msra.gmra.mxu0 %vm83_vm0, %v1341_v6 }
 0x717   :  { %v1798_v43 = vpop.f32.mrf.mxu0 }
 0x718   :  { %v1643_v17 = vmul.f32 -1.442695, %v1798_v43 }
 0x719   :  { %v1419_v18 = vpop.f32.mrf.mxu0 }
 0x71a   :  { %1908 = vpow2.f32 %v1643_v17  ;;  %v1642_v19 = vmul.f32 -1.442695, %v1419_v18 }
 0x71c   :  { %1910 = vpow2.f32 %v1642_v19 }
 0x727   :  { %v1909_v20 = vpop.eup %1908 }
 0x728   :  { %v1435_v22 = vadd.f32 1.0, %v1909_v20 }
 0x729   :  { %v1911_v23 = vpop.eup %1910 }
 0x72a   :  { %v1434_v26 = vadd.f32 1.0, %v1911_v23  ;;  %1912 = vrcp.f32 %v1435_v22 }
 0x72c   :  { %1914 = vrcp.f32 %v1434_v26 }
 0x737   :  { %v1913_v39 = vpop.eup %1912 }
 0x738   :  { %v1441_v25 = vmul.f32 %v1913_v39, %v1798_v43 }
 0x739   :  { %v1915_v27 = vpop.eup %1914 }
 0x73a   :  { %v1440_v28 = vmul.f32 %v1915_v27, %v1419_v18 }
 0x73c   :  { %1807 = vmatprep.mubr.msk.f32.mxu1 %vm83_vm0, %v1440_v28 }
 0x73d   :  { %1808 = vmatmul.mubr.msk.f32.vlgmr.msra.gmra.mxu1 %vm83_vm0, %v1441_v25 }
 0x7fd   :  { %v1809_v29 = vpop.f32.mrf.mxu1 }
 0x7fe   :  { %v1647_v30 = vmul.f32 -1.442695, %v1809_v29 }
 0x7ff   :  { %v1519_v31 = vpop.f32.mrf.mxu1 }
 0x800   :  { %1916 = vpow2.f32 %v1647_v30  ;;  %v1646_v61 = vmul.f32 -1.442695, %v1519_v31 }
 0x802   :  { %1918 = vpow2.f32 %v1646_v61 }
 0x80d   :  { %v1917_v32 = vpop.eup %1916 }
 0x80e   :  { %v1535_v40 = vadd.f32 1.0, %v1917_v32 }
 0x80f   :  { %v1919_v21 = vpop.eup %1918 }
 0x810   :  { %1920 = vrcp.f32 %v1535_v40  ;;  %v1534_v12 = vadd.f32 1.0, %v1919_v21 }
 0x812   :  { %1922 = vrcp.f32 %v1534_v12 }
 0x81d   :  { %v1921_v16 = vpop.eup %1920 }
 0x81e   :  { %v1541_v24 = vmul.f32 %v1921_v16, %v1809_v29 }
 0x81f   :  { %v1923_v33 = vpop.eup %1922 }
 0x820   :  { %v1543_v35 = vadd.f32 %v1541_v24, %v1341_v6  ;;  %v1540_v36 = vmul.f32 %v1923_v33, %v1519_v31 }
 0x822   :  { %1555 = vst.msk [vmem:[#allocation9 + $0x8] sm:$0xff] %vm83_vm0, %v1543_v35  ;;  %v1542_v38 = vadd.f32 %v1540_v36, %v1340_v8 }
 0x823   :  { %1566 = vst.msk [vmem:[#allocation9 + $0x8] sm:$0xff] %vm1564_vm7, %v1561_v37 }
 0x824   :  { %1554 = vst.msk [vmem:[#allocation9] sm:$0xff] %vm83_vm0, %v1542_v38 }
 0x825   :  { %1565 = vst.msk [vmem:[#allocation9] sm:$0xff] %vm1564_vm7, %v1559_v41 }
 0x826   :  { %1995 = shalt.err (!%p1992_p5)
}
 0x827   :  { %1578 = dma.vmem_to_hbm [thread:$0]  %s1573_s4, 256, %s2378_s10, [#allocation5], %s2011_s16, %s2011_s16, %s2012_s17  }
 0x828   :  { %2008 = dma.done.wait [#allocation5], 256  }
 0x829   :  { %2009 = vsyncadd [#allocation5], 4294967040 }
 0x82a   :  { %1582 = vsyncpa [#allocation4], 1 }
 0x82b   :  { %1583 = vsyncpa [#allocation7], 1 }
 0x82c   :  { %1584 = vsyncpa [#allocation5], 1 }

</bundles_post_ra>
